<compile_context>
chip_gen: v5e
topology: v5e:2x2
jax: 0.10.0
libtpu: 0.0.40
codegen_flags: <defaults>
</compile_context>

<pallas_src>
import math

import jax
import jax.numpy as jnp
from jax.experimental import pallas as pl
from jax.experimental.pallas import tpu as pltpu


_PAD_NEG = -1e30  # bias for padded vocab columns: exp() underflows to 0


def _round_up(x, m):
    return ((x + m - 1) // m) * m


def _vmem_capacity_bytes():
    """Physical VMEM of the attached TPU; conservative 64 MiB fallback."""
    try:
        info = pltpu.get_tpu_info()
        cap = getattr(info, "vmem_capacity_bytes", None)
        if cap:
            return int(cap)
    except Exception:
        pass
    return 64 * 1024 * 1024


def _choose_tiles(M, Hp, V, tile_m_req, tile_v_req, budget):
    """Pick (tile_m, tile_v, Mp, Vp) under a VMEM byte budget.

    Cost model (bf16 operands, f32 staged output):
      fixed   = double-buffered streamed weight tile + resident bias
      per_row = double-buffered x row (bf16) + double-buffered full-V f32 row
    """
    # Vocab tile: lane-dense multiple of 128, no wider than the rounded vocab.
    tile_v = min(_round_up(V, 128), max(128, _round_up(int(tile_v_req), 128)))
    # Shrink tile_v if the double-buffered weight tile alone would exceed
    # ~1/4 of the budget (leaves room for the row tiles and the output).
    while tile_v > 128 and (2 * Hp * tile_v * 2) > budget // 4:
        tile_v = max(128, ((tile_v // 2) // 128) * 128)
    Vp = _round_up(V, tile_v)

    fixed = 2 * Hp * tile_v * 2 + 2 * Vp * 4
    per_row = 2 * Hp * 2 + 2 * Vp * 4
    cap = max(8, (budget - fixed) // per_row)

    if tile_m_req is not None:
        tile_m = max(8, _round_up(int(tile_m_req), 8))
    else:
        # Largest multiple of 8 that fits (capped at 512): weight HBM traffic
        # scales as 1/tile_m, so bigger always wins when bandwidth-bound.
        tile_m = max(8, min(512, (cap // 8) * 8))

    tile_m = min(tile_m, _round_up(M, 8))
    tile_m = max(8, (tile_m // 8) * 8)
    Mp = _round_up(M, tile_m)
    return tile_m, tile_v, Mp, Vp


def generator_kernel(x_ref, w_ref, b_ref, o_ref, m_sc, l_sc):
    # x_ref: (TM, Hp) bf16/f32    w_ref: (Hp, TV) bf16/f32
    # b_ref: (1, Vp)  f32 (resident)
    # o_ref: (TM, Vp) f32        -- resident across the vocab grid axis
    # m_sc/l_sc: (TM, 1) f32 running max / running sum-of-exp
    j = pl.program_id(1)
    nv = pl.num_programs(1)
    tile_v = w_ref.shape[1]

    @pl.when(j == 0)
    def _init():
        m_sc[...] = jnp.full(m_sc.shape, -jnp.inf, dtype=m_sc.dtype)
        l_sc[...] = jnp.zeros(l_sc.shape, dtype=l_sc.dtype)

    # Logits for this vocab tile (bf16 operands, f32 accumulation on the MXU).
    logits = jnp.dot(x_ref[...], w_ref[...], preferred_element_type=jnp.float32)
    col = pl.multiple_of(j * tile_v, 128)
    logits = logits + b_ref[:, pl.ds(col, tile_v)].astype(jnp.float32)

    # Online (flash-style) log-sum-exp update.
    m_prev = m_sc[...]
    m_new = jnp.maximum(m_prev, jnp.max(logits, axis=-1, keepdims=True))
    l_sc[...] = l_sc[...] * jnp.exp(m_prev - m_new) + jnp.sum(
        jnp.exp(logits - m_new), axis=-1, keepdims=True)
    m_sc[...] = m_new

    # Stage raw f32 logits into the resident output row block (lane-dense,
    # 128-aligned dynamic column window).
    o_ref[:, pl.ds(col, tile_v)] = logits

    # Finalize: subtract the full-row logsumexp once, on the last vocab step.
    @pl.when(j == nv - 1)
    def _finalize():
        lse = m_sc[...] + jnp.log(l_sc[...])
        o_ref[...] = o_ref[...] - lse


def generator_forward(x, w, b, *, tile_m=None, tile_v=1024, out_dtype=None,
                      compute_dtype=jnp.bfloat16,
                      vmem_budget_bytes=None, vmem_limit_bytes=None):
    """x: (..., H); w: (H, V); b: (V,) -> (..., V) log-probs.

    Equivalent to PyTorch's LogSoftmax(Linear(x)) with the weight of shape
    (V, H) stored here transposed as (H, V).  By default the matmul operands
    are cast to bf16 (f32 accumulation); pass compute_dtype=jnp.float32 for
    exact-f32 compute.
    """
    lead = x.shape[:-1]
    H = x.shape[-1]
    Hw, V = w.shape
    assert Hw == H, "weight/input hidden-size mismatch"
    M = int(math.prod(lead)) if lead else 1
    out_dtype = x.dtype if out_dtype is None else out_dtype

    # Generation-aware VMEM budget (v5e/v6e: 128 MiB, v7x: 64 MiB).
    cap_bytes = _vmem_capacity_bytes()
    if vmem_budget_bytes is None:
        vmem_budget_bytes = int(0.65 * cap_bytes)
    if vmem_limit_bytes is None:
        vmem_limit_bytes = min(int(0.85 * cap_bytes),
                               int(vmem_budget_bytes) + (16 << 20))

    Hp = _round_up(H, 128)
    tm, tv, Mp, Vp = _choose_tiles(M, Hp, V, tile_m, tile_v, vmem_budget_bytes)

    # Wrapper-side cast + padding (skipped when already aligned).  Zeros are
    # exact for the contraction dim; padded vocab columns get a huge negative
    # bias so they vanish from the softmax.
    x2 = x.reshape(M, H).astype(compute_dtype)
    xp = x2 if (Mp == M and Hp == H) else jnp.pad(x2, ((0, Mp - M), (0, Hp - H)))
    wc = w.astype(compute_dtype)
    wp = wc if (Hp == H and Vp == V) else jnp.pad(wc, ((0, Hp - H), (0, Vp - V)))
    b2 = b.reshape(1, V).astype(jnp.float32)
    bp = b2 if Vp == V else jnp.pad(b2, ((0, 0), (0, Vp - V)),
                                    constant_values=_PAD_NEG)

    grid = (Mp // tm, Vp // tv)

    out = pl.pallas_call(
        generator_kernel,
        out_shape=jax.ShapeDtypeStruct((Mp, Vp), jnp.float32),
        grid_spec=pltpu.PrefetchScalarGridSpec(
            num_scalar_prefetch=0,
            grid=grid,
            in_specs=[
                pl.BlockSpec((tm, Hp), lambda i, j: (i, 0)),   # row tile of x
                pl.BlockSpec((Hp, tv), lambda i, j: (0, j)),   # streamed weight
                pl.BlockSpec((1, Vp), lambda i, j: (0, 0)),    # resident bias
            ],
            out_specs=pl.BlockSpec((tm, Vp), lambda i, j: (i, 0)),
            scratch_shapes=[
                pltpu.VMEM((tm, 1), jnp.float32),   # running max
                pltpu.VMEM((tm, 1), jnp.float32),   # running sum of exp
            ],
        ),
        compiler_params=pltpu.CompilerParams(
            dimension_semantics=("parallel", "arbitrary"),
            vmem_limit_bytes=int(vmem_limit_bytes),
        ),
    )(xp, wp, bp)

    out = out[:M, :V]
    if jnp.dtype(out_dtype) != jnp.dtype(jnp.float32):
        out = out.astype(out_dtype)
    return out.reshape(*lead, V)


if __name__ == "__main__":
    key = jax.random.PRNGKey(0)
    kx, kw, kb, kx2, kw2, kb2 = jax.random.split(key, 6)

    # Case 1: shapes implied by the module (hidden_size=32, output_size=128),
    # default bf16-operand / f32-accumulate path.
    B, S, H, V = 2, 8, 32, 128
    x = jax.random.normal(kx, (B, S, H), dtype=jnp.float32)
    w = jax.random.normal(kw, (H, V), dtype=jnp.float32) * (1.0 / jnp.sqrt(H))
    b = jax.random.normal(kb, (V,), dtype=jnp.float32) * 0.01

    y = generator_forward(x, w, b)
    jax.block_until_ready(y)
    ref = jax.nn.log_softmax(x @ w + b, axis=-1)
    assert y.shape == ref.shape, "case 1 shape mismatch"
    assert jnp.allclose(y, ref, atol=5e-2, rtol=2e-2), "case 1 mismatch (bf16 path)"

    # Case 2: awkward sizes -> exercises row/H/V padding, the resident bias,
    # and the multi-tile vocab sweep (online log-softmax), in exact f32.
    B2, S2, H2, V2 = 3, 5, 48, 300
    x2 = jax.random.normal(kx2, (B2, S2, H2), dtype=jnp.float32)
    w2 = jax.random.normal(kw2, (H2, V2), dtype=jnp.float32) * (1.0 / jnp.sqrt(H2))
    b2 = jax.random.normal(kb2, (V2,), dtype=jnp.float32) * 0.01

    y2 = generator_forward(x2, w2, b2, tile_m=8, tile_v=128,
                           compute_dtype=jnp.float32)
    jax.block_until_ready(y2)
    ref2 = jax.nn.log_softmax(x2 @ w2 + b2, axis=-1)
    assert jnp.allclose(y2, ref2, atol=1e-4, rtol=1e-5), "case 2 mismatch (f32 path)"

    print("KERNEL_OK")
</pallas_src>

<mosaic_0001>
module attributes {stable_mosaic.version = 11 : i64} {
  func.func @generator_kernel(%arg0: i32, %arg1: i32, %arg2: memref<16x128xbf16, #tpu.memory_space<vmem>>, %arg3: memref<128x128xbf16, #tpu.memory_space<vmem>>, %arg4: memref<1x128xf32, #tpu.memory_space<vmem>>, %arg5: memref<16x128xf32, #tpu.memory_space<vmem>>, %arg6: memref<16x1xf32, #tpu.memory_space<vmem>>, %arg7: memref<16x1xf32, #tpu.memory_space<vmem>>) attributes {dimension_semantics = [#tpu.dimension_semantics<parallel>, #tpu.dimension_semantics<arbitrary>], iteration_bounds = array<i64: 1, 1>, scalar_prefetch = 0 : i64, scratch_operands = 2 : i64, tpu.core_type = #tpu.core_type<tc>, window_params = [{transform_indices = @transform_0, window_bounds = array<i64: 16, 128>}, {transform_indices = @transform_1, window_bounds = array<i64: 128, 128>}, {pipeline_mode = #tpu.pipeline_mode<synchronous>, transform_indices = @transform_2, window_bounds = array<i64: 1, 128>}, {transform_indices = @transform_3, window_bounds = array<i64: 16, 128>}]} {
    %c0_i32 = arith.constant 0 : i32
    %0 = arith.cmpi eq, %arg1, %c0_i32 : i32
    %1 = arith.extui %0 : i1 to i32
    %c0_i32_0 = arith.constant 0 : i32
    %2 = arith.cmpi ne, %1, %c0_i32_0 : i32
    scf.if %2 {
      %cst_18 = arith.constant 0xFF800000 : f32
      %33 = vector.broadcast %cst_18 : f32 to vector<16x1xf32>
      %c0_19 = arith.constant 0 : index
      %c0_20 = arith.constant 0 : index
      %34 = vector.load %arg6[%c0_19, %c0_20] : memref<16x1xf32, #tpu.memory_space<vmem>>, vector<16x1xf32>
      tpu.vector_store %arg6[%c0_19, %c0_20], %33 {strides = array<i32>} : memref<16x1xf32, #tpu.memory_space<vmem>>, vector<16x1xf32>,
      %cst_21 = arith.constant 0.000000e+00 : f32
      %35 = vector.broadcast %cst_21 : f32 to vector<16x1xf32>
      %c0_22 = arith.constant 0 : index
      %c0_23 = arith.constant 0 : index
      %36 = vector.load %arg7[%c0_22, %c0_23] : memref<16x1xf32, #tpu.memory_space<vmem>>, vector<16x1xf32>
      tpu.vector_store %arg7[%c0_22, %c0_23], %35 {strides = array<i32>} : memref<16x1xf32, #tpu.memory_space<vmem>>, vector<16x1xf32>,
    } else {
    }
    %c0 = arith.constant 0 : index
    %c0_1 = arith.constant 0 : index
    %3 = vector.load %arg2[%c0, %c0_1] : memref<16x128xbf16, #tpu.memory_space<vmem>>, vector<16x128xbf16>
    %c0_2 = arith.constant 0 : index
    %c0_3 = arith.constant 0 : index
    %4 = vector.load %arg3[%c0_2, %c0_3] : memref<128x128xbf16, #tpu.memory_space<vmem>>, vector<128x128xbf16>
    %cst = arith.constant dense<0.000000e+00> : vector<16x128xf32>
    %5 = tpu.matmul %3, %4, %cst {dimension_numbers = #tpu.dot_dimension_numbers<[1], [0], [0], [1], [0, 0, 1, 1], [], []>} : vector<16x128xbf16>, vector<128x128xbf16>, vector<16x128xf32> -> vector<16x128xf32>
    %c128_i32 = arith.constant 128 : i32
    %6 = arith.muli %arg1, %c128_i32 : i32
    %7 = tpu.assume_multiple %6, 128 : i32
    %c0_4 = arith.constant 0 : index
    %8 = arith.index_cast %7 : i32 to index
    %9 = vector.load %arg4[%c0_4, %8] : memref<1x128xf32, #tpu.memory_space<vmem>>, vector<1x128xf32>
    %10 = vector.broadcast %9 : vector<1x128xf32> to vector<16x128xf32>
    %11 = arith.addf %5, %10 : vector<16x128xf32>
    %c0_5 = arith.constant 0 : index
    %c0_6 = arith.constant 0 : index
    %12 = vector.load %arg6[%c0_5, %c0_6] : memref<16x1xf32, #tpu.memory_space<vmem>>, vector<16x1xf32>
    %cst_7 = arith.constant dense<0xFF800000> : vector<16xf32>
    %13 = vector.multi_reduction <maximumf>, %11, %cst_7 [1] : vector<16x128xf32> to vector<16xf32>
    %14 = vector.shape_cast %13 : vector<16xf32> to vector<16x1xf32>
    %15 = arith.maximumf %12, %14 : vector<16x1xf32>
    %c0_8 = arith.constant 0 : index
    %c0_9 = arith.constant 0 : index
    %16 = vector.load %arg7[%c0_8, %c0_9] : memref<16x1xf32, #tpu.memory_space<vmem>>, vector<16x1xf32>
    %17 = arith.subf %12, %15 : vector<16x1xf32>
    %18 = math.exp %17 : vector<16x1xf32>
    %19 = arith.mulf %16, %18 : vector<16x1xf32>
    %20 = vector.broadcast %15 : vector<16x1xf32> to vector<16x128xf32>
    %21 = arith.subf %11, %20 : vector<16x128xf32>
    %22 = math.exp %21 : vector<16x128xf32>
    %cst_10 = arith.constant dense<0.000000e+00> : vector<16xf32>
    %23 = vector.multi_reduction <add>, %22, %cst_10 [1] : vector<16x128xf32> to vector<16xf32>
    %24 = vector.shape_cast %23 : vector<16xf32> to vector<16x1xf32>
    %25 = arith.addf %19, %24 : vector<16x1xf32>
    %c0_11 = arith.constant 0 : index
    %c0_12 = arith.constant 0 : index
    %26 = vector.load %arg7[%c0_11, %c0_12] : memref<16x1xf32, #tpu.memory_space<vmem>>, vector<16x1xf32>
    tpu.vector_store %arg7[%c0_11, %c0_12], %25 {strides = array<i32>} : memref<16x1xf32, #tpu.memory_space<vmem>>, vector<16x1xf32>,
    %c0_13 = arith.constant 0 : index
    %c0_14 = arith.constant 0 : index
    %27 = vector.load %arg6[%c0_13, %c0_14] : memref<16x1xf32, #tpu.memory_space<vmem>>, vector<16x1xf32>
    tpu.vector_store %arg6[%c0_13, %c0_14], %15 {strides = array<i32>} : memref<16x1xf32, #tpu.memory_space<vmem>>, vector<16x1xf32>,
    %c0_15 = arith.constant 0 : index
    %28 = arith.index_cast %7 : i32 to index
    %29 = vector.load %arg5[%c0_15, %28] : memref<16x128xf32, #tpu.memory_space<vmem>>, vector<16x128xf32>
    tpu.vector_store %arg5[%c0_15, %28], %11 {strides = array<i32>} : memref<16x128xf32, #tpu.memory_space<vmem>>, vector<16x128xf32>,
    %c0_i32_16 = arith.constant 0 : i32
    %30 = arith.cmpi eq, %arg1, %c0_i32_16 : i32
    %31 = arith.extui %30 : i1 to i32
    %c0_i32_17 = arith.constant 0 : i32
    %32 = arith.cmpi ne, %31, %c0_i32_17 : i32
    scf.if %32 {
      %c0_18 = arith.constant 0 : index
      %c0_19 = arith.constant 0 : index
      %33 = vector.load %arg6[%c0_18, %c0_19] : memref<16x1xf32, #tpu.memory_space<vmem>>, vector<16x1xf32>
      %c0_20 = arith.constant 0 : index
      %c0_21 = arith.constant 0 : index
      %34 = vector.load %arg7[%c0_20, %c0_21] : memref<16x1xf32, #tpu.memory_space<vmem>>, vector<16x1xf32>
      %35 = math.log %34 : vector<16x1xf32>
      %36 = arith.addf %33, %35 : vector<16x1xf32>
      %c0_22 = arith.constant 0 : index
      %c0_23 = arith.constant 0 : index
      %37 = vector.load %arg5[%c0_22, %c0_23] : memref<16x128xf32, #tpu.memory_space<vmem>>, vector<16x128xf32>
      %38 = vector.broadcast %36 : vector<16x1xf32> to vector<16x128xf32>
      %39 = arith.subf %37, %38 : vector<16x128xf32>
      %c0_24 = arith.constant 0 : index
      %c0_25 = arith.constant 0 : index
      %40 = vector.load %arg5[%c0_24, %c0_25] : memref<16x128xf32, #tpu.memory_space<vmem>>, vector<16x128xf32>
      tpu.vector_store %arg5[%c0_24, %c0_25], %39 {strides = array<i32>} : memref<16x128xf32, #tpu.memory_space<vmem>>, vector<16x128xf32>,
    } else {
    }
    return
  }
  func.func @transform_0(%arg0: i32, %arg1: i32) -> (i32, i32) {
    %c0_i32 = arith.constant 0 : i32
    %c0_i32_0 = arith.constant 0 : i32
    return %arg0, %c0_i32 : i32, i32
  }
  func.func @transform_1(%arg0: i32, %arg1: i32) -> (i32, i32) {
    %c0_i32 = arith.constant 0 : i32
    %c0_i32_0 = arith.constant 0 : i32
    return %c0_i32, %arg1 : i32, i32
  }
  func.func @transform_2(%arg0: i32, %arg1: i32) -> (i32, i32) {
    %c0_i32 = arith.constant 0 : i32
    %c0_i32_0 = arith.constant 0 : i32
    %c0_i32_1 = arith.constant 0 : i32
    return %c0_i32, %c0_i32_0 : i32, i32
  }
  func.func @transform_3(%arg0: i32, %arg1: i32) -> (i32, i32) {
    %c0_i32 = arith.constant 0 : i32
    %c0_i32_0 = arith.constant 0 : i32
    return %arg0, %c0_i32 : i32, i32
  }
}

</mosaic_0001>

<bundles_post_ra>
// kernel: tpu_custom_call.1
= control target key start
LH: loop header
LB: loop body
LE: loop exit
PB: predicated region body
PF: predicated region fallthrough
CT: control target
= control target key end

     0   :  { %8 = vsyncpa [#allocation5], 0  ;;  %s457_s0 = inlined_call_operand.hbm [shape: bf16[16,128], index: 0, kind: input, shape index: {}]   ;;  %s458_s1 = inlined_call_operand.hbm [shape: bf16[128,128], index: 1, kind: input, shape index: {}]   ;;  %s459_s2 = inlined_call_operand.vmem [shape: f32[1,128], index: 2, kind: input, shape index: {}]   ;;  %s460_s3 = inlined_call_operand.hbm [shape: f32[16,128], index: 3, kind: output, shape index: {}]  }
   0x1   :  { %9 = vsyncpa [#allocation8], 0 }
   0x2   :  { %10 = vsyncpa [#allocation6], 0  ;;  %s15_s14 = sshll.u32 %s457_s0, 4  ;;  %s397_s15 = smov [#allocation4]   ;;  %s16_s14 = int_to_ptr.hbm [resolvable:$true] %s15_s14 }
   0x3   :  { %s17_s16 = sshll.u32 %s397_s15, 4  ;;  %s28_s19 = sshll.u32 %s458_s1, 4  ;;  %s18_s16 = int_to_ptr.vmem [resolvable:$true] %s17_s16  ;;  %s29_s19 = int_to_ptr.hbm [resolvable:$true] %s28_s19 }
   0x4   :  { %s398_s20 = smov 64   ;;  %s399_s21 = smov 4  }
   0x5   :  { %23 = dma.hbm_to_vmem [thread:$0]  %s16_s14, 128, %s18_s16, [#allocation5], %s398_s20, %s398_s20, %s399_s21  }
   0x6   :  { %s400_s22 = smov [#allocation7]  }
   0x7   :  { %s30_s23 = sshll.u32 %s400_s22, 4  ;;  %s31_s23 = int_to_ptr.vmem [resolvable:$true] %s30_s23 }
   0x8   :  { %36 = dma.hbm_to_vmem [thread:$0]  %s29_s19, 1024, %s31_s23, [#allocation8], %s398_s20, %s398_s20, %s399_s21  }
   0x9   :  { %391 = dma.done.wait [#allocation5], 128  }
   0xa   :  { %392 = vsyncadd [#allocation5], 4294967168 }
   0xb   :  { %393 = dma.done.wait [#allocation8], 1024  }
   0xc   :  { %394 = vsyncadd [#allocation8], 4294966272  ;;  %v293_v0 = vld [vmem:[#allocation7 + $0x38] sm:$0xff]  ;;  %v292_v1 = vld [vmem:[#allocation7 + $0x30] sm:$0xff]  ;;  %vm51_vm0 = vcmask 7168   ;;  %v401_v9 = vmov -inf  }
   0xd   :  { %136 = vmatpush.bf16.msra.mxu0 %v293_v0  ;;  %v291_v2 = vld [vmem:[#allocation7 + $0x28] sm:$0xff]  ;;  %v290_v3 = vld [vmem:[#allocation7 + $0x20] sm:$0xff]  ;;  %v289_v4 = vld [vmem:[#allocation7 + $0x18] sm:$0xff]  ;;  %52 = vst.msk [vmem:[#allocation2] sm:$0xff] %vm51_vm0, %v401_v9  ;;  %v402_v15 = vmov 0   ;;  %v403_v16 = vmov 0.0  }
   0xe   :  { %v288_v5 = vld [vmem:[#allocation7 + $0x10] sm:$0xff]  ;;  %v287_v6 = vld [vmem:[#allocation7 + $0x8] sm:$0xff]  ;;  %v286_v7 = vld [vmem:[#allocation7] sm:$0xff]  ;;  %53 = vst.msk [vmem:[#allocation2 + $0x8] sm:$0xff] %vm51_vm0, %v401_v9  ;;  %304 = vset.pattern.permute.xlu1 %v402_v15  ;;  %305 = vset.pattern.permute.xlu0 %v402_v15  ;;  %s233_s27 = sshll.u32 %s460_s3, 4  ;;  %s405_s28 = smov 128   ;;  %s234_s27 = int_to_ptr.hbm [resolvable:$true] %s233_s27 }
   0xf   :  { %v285_v8 = vld [vmem:[#allocation4] sm:$0xff]  ;;  %54 = vst.msk [vmem:[#allocation3] sm:$0xff] %vm51_vm0, %v403_v16  ;;  %s406_s29 = smov 8  }
  0x10   :  { %v306_v10 = vld [vmem:[%s459_s2] ss:$0 sm:$0xff]  ;;  %55 = vst.msk [vmem:[#allocation3 + $0x8] sm:$0xff] %vm51_vm0, %v403_v16  ;;  %s404_s2 = smov [#allocation9]  }
  0x11   :  { %137 = vmatpush.bf16.msra.mxu0 %v292_v1  ;;  %s231_s24 = sshll.u32 %s404_s2, 4  ;;  %s232_s24 = int_to_ptr.vmem [resolvable:$true] %s231_s24 }
  0x14   :  { %v150_v17 = vld [vmem:[#allocation2] sm:$0xff] }
  0x15   :  { %138 = vmatpush.bf16.msra.mxu0 %v291_v2  ;;  %v151_v21 = vld [vmem:[#allocation2 + $0x8] sm:$0xff] }
  0x16   :  { %v158_v36 = vld [vmem:[#allocation3] sm:$0xff] }
  0x17   :  { %v159_v41 = vld [vmem:[#allocation3 + $0x8] sm:$0xff] }
  0x19   :  { %139 = vmatpush.bf16.msra.mxu0 %v290_v3 }
  0x1d   :  { %140 = vmatpush.bf16.msra.mxu0 %v289_v4 }
  0x21   :  { %141 = vmatpush.bf16.msra.mxu0 %v288_v5 }
  0x25   :  { %142 = vmatpush.bf16.msra.mxu0 %v287_v6 }
  0x29   :  { %143 = vmatpush.bf16.msra.mxu0 %v286_v7 }
  0x2c   :  { %144 = vmatmul.bf16.vlgmr.msra.gmra.mxu0 %v285_v8 }
  0xa9   :  { %v145_v11 = vpop.f32.mrf.mxu0 }
  0xaa   :  { %v438_v12 = vadd.f32 %v306_v10, %v145_v11 }
  0xac   :  { %152 = vmax.xlane.f32.xlu0 %v438_v12 }
  0xb1   :  { %v147_v13 = vpop.f32.mrf.mxu0 }
  0xb2   :  { %v441_v14 = vadd.f32 %v306_v10, %v147_v13 }
  0xb4   :  { %154 = vmax.xlane.f32.xlu0 %v441_v14 }
 0x11f   :  { %v153_v18 = vpop.xlane.xlu0 %152 }
 0x120   :  { %v156_v19 = vmax.f32 %v150_v17, %v153_v18 }
 0x122   :  { %v160_v20 = vsub.f32 %v150_v17, %v156_v19  ;;  %193 = vst.msk [vmem:[#allocation2] sm:$0xff] %vm51_vm0, %v156_v19  ;;  %170 = vperm.xlu1 %304, %v156_v19  }
 0x124   :  { %v162_v33 = vmul.f32 1.442695, %v160_v20 }
 0x127   :  { %v155_v22 = vpop.xlane.xlu0 %154 }
 0x128   :  { %v157_v23 = vmax.f32 %v151_v21, %v155_v22 }
 0x129   :  { %v201_v49 = vld [vmem:[#allocation2] sm:$0xff] }
 0x12a   :  { %v161_v24 = vsub.f32 %v151_v21, %v157_v23  ;;  %194 = vst.msk [vmem:[#allocation2 + $0x8] sm:$0xff] %vm51_vm0, %v157_v23  ;;  %175 = vperm.xlu1 %304, %v157_v23  }
 0x12c   :  { %v164_v34 = vmul.f32 1.442695, %v161_v24 }
 0x131   :  { %v202_v53 = vld [vmem:[#allocation2 + $0x8] sm:$0xff] }
 0x194   :  { %v171_v25 = vpop.permute.xlu1 %170 }
 0x195   :  { %v178_v26 = vsub.f32 %v438_v12, %v171_v25 }
 0x197   :  { %v180_v27 = vmul.f32 1.442695, %v178_v26 }
 0x199   :  { %307 = vpow2.f32 %v180_v27 }
 0x19c   :  { %v176_v28 = vpop.permute.xlu1 %175 }
 0x19d   :  { %v179_v29 = vsub.f32 %v441_v14, %v176_v28 }
 0x19f   :  { %v308_v30 = vpop.eup %307  ;;  %v182_v31 = vmul.f32 1.442695, %v179_v29 }
 0x1a0   :  { %184 = vadd.xlane.f32.xlu2 %v308_v30 }
 0x1a1   :  { %309 = vpow2.f32 %v182_v31 }
 0x1a2   :  { %311 = vpow2.f32 %v162_v33 }
 0x1a3   :  { %313 = vpow2.f32 %v164_v34 }
 0x1a7   :  { %v310_v32 = vpop.eup %309 }
 0x1a8   :  { %186 = vadd.xlane.f32.xlu2 %v310_v32  ;;  %v312_v35 = vpop.eup %311 }
 0x1a9   :  { %v166_v37 = vmul.f32 %v312_v35, %v158_v36  ;;  %v314_v40 = vpop.eup %313 }
 0x1aa   :  { %v167_v42 = vmul.f32 %v314_v40, %v159_v41 }
 0x213   :  { %v185_v38 = vpop.xlane.xlu2 %184 }
 0x214   :  { %v188_v39 = vadd.f32 %v185_v38, %v166_v37 }
 0x216   :  { %191 = vst.msk [vmem:[#allocation3] sm:$0xff] %vm51_vm0, %v188_v39 }
 0x21b   :  { %v187_v43 = vpop.xlane.xlu2 %186 }
 0x21c   :  { %v189_v44 = vadd.f32 %v187_v43, %v167_v42 }
 0x21d   :  { %v203_v45 = vld [vmem:[#allocation3] sm:$0xff] }
 0x21e   :  { %192 = vst.msk [vmem:[#allocation3 + $0x8] sm:$0xff] %vm51_vm0, %v189_v44  ;;  %315 = vlog2.f32 %v203_v45 }
 0x224   :  { %v316_v46 = vpop.eup %315 }
 0x225   :  { %v206_v47 = vmul.f32 0.6931472, %v316_v46  ;;  %v204_v48 = vld [vmem:[#allocation3 + $0x8] sm:$0xff] }
 0x226   :  { %317 = vlog2.f32 %v204_v48 }
 0x227   :  { %v209_v50 = vadd.f32 %v206_v47, %v201_v49 }
 0x229   :  { %215 = vperm.xlu0 %305, %v209_v50  }
 0x22c   :  { %v318_v51 = vpop.eup %317 }
 0x22d   :  { %v208_v52 = vmul.f32 0.6931472, %v318_v51 }
 0x22f   :  { %v210_v54 = vadd.f32 %v208_v52, %v202_v53 }
 0x231   :  { %220 = vperm.xlu1 %304, %v210_v54  }
 0x29b   :  { %v216_v55 = vpop.permute.xlu0 %215 }
 0x29c   :  { %v223_v56 = vsub.f32 %v438_v12, %v216_v55 }
 0x29e   :  { %225 = vst [vmem:[#allocation9] sm:$0xff] %v223_v56 }
 0x2a3   :  { %v221_v57 = vpop.permute.xlu1 %220 }
 0x2a4   :  { %v224_v58 = vsub.f32 %v441_v14, %v221_v57 }
 0x2a6   :  { %226 = vst [vmem:[#allocation9 + $0x8] sm:$0xff] %v224_v58 }
 0x2a7   :  { %239 = dma.vmem_to_hbm [thread:$0]  %s232_s24, 256, %s234_s27, [#allocation6], %s405_s28, %s405_s28, %s406_s29  }
 0x2a8   :  { %395 = dma.done.wait [#allocation6], 256  }
 0x2a9   :  { %396 = vsyncadd [#allocation6], 4294967040 }
 0x2aa   :  { %244 = vsyncpa [#allocation5], 1 }
 0x2ab   :  { %245 = vsyncpa [#allocation8], 1 }
 0x2ac   :  { %246 = vsyncpa [#allocation6], 1 }

</bundles_post_ra>
